<compile_context>
chip_gen: v7x
topology: tpu7x:2x2x1
jax: 0.10.0
libtpu: 0.0.40
codegen_flags: <defaults>
</compile_context>

<pallas_src>
import functools

import numpy as np
import jax
import jax.numpy as jnp
from jax import lax
from jax.experimental import pallas as pl
from jax.experimental.pallas import tpu as pltpu

EPS = 1e-5


def _device_kind():
    try:
        return jax.devices()[0].device_kind.lower()
    except Exception:  # pragma: no cover
        return ""


_KIND = _device_kind()
_IS_V7 = "v7" in _KIND
# bf16 EUP (exp) only exists on v6e/v7x; on v5e keep the softmax exp in f32.
_EXP_DTYPE = jnp.bfloat16 if ("v6" in _KIND or _IS_V7) else jnp.float32
# v7x has 64 MiB physical VMEM per TC -> leave headroom; v5e/v6e have 128 MiB.
_VMEM_LIMIT = (48 if _IS_V7 else 64) * 1024 * 1024


# ----------------------------------------------------------------------------
# bilinear resize matrices (PyTorch F.interpolate, mode='bilinear',
# align_corners=False).  Resizing along H and W is then two small matmuls.
# ----------------------------------------------------------------------------
def interp_matrix(out_size, in_size):
    dst = np.arange(out_size)
    src = (dst + 0.5) * (in_size / out_size) - 0.5
    src = np.clip(src, 0.0, None)
    x0 = np.minimum(np.floor(src).astype(np.int64), in_size - 1)
    x1 = np.minimum(x0 + 1, in_size - 1)
    lam = (src - x0).astype(np.float32)
    m = np.zeros((out_size, in_size), np.float32)
    m[dst, x0] += 1.0 - lam
    m[dst, x1] += lam
    return jnp.asarray(m)


def _round_up(x, m):
    return ((x + m - 1) // m) * m


def _pick_tile(n, max_tile):
    """Largest lane-aligned tile (multiple of 128) dividing n, capped at max_tile."""
    if n <= max_tile:
        return n
    t = (max_tile // 128) * 128
    while t >= 128:
        if n % t == 0:
            return t
        t -= 128
    return n


def _attention_tiles(b, n, *, tq_max=1024, tkv_max=512):
    tq = _pick_tile(n, tq_max)
    tkv = _pick_tile(n, tkv_max)
    # Keep >= 2 "parallel" grid units so both v7x TensorCores get work.
    while (b * (n // tq) < 2 and tq % 2 == 0 and tq // 2 >= 128
           and n % (tq // 2) == 0):
        tq //= 2
    return tq, tkv


# ----------------------------------------------------------------------------
# Kernel 0: fused theta/phi/g projection (three 1x1 convs in one MXU pass).
# x_down is channel-major (B, C, N); output is bf16 (B, 3*ICp, N) with rows
# [0:ICp]=theta, [ICp:2ICp]=phi, [2ICp:3ICp]=g.
# ----------------------------------------------------------------------------
def _proj_kernel(x_ref, w_ref, b_ref, o_ref):
    o_ref[0] = (jnp.dot(w_ref[...], x_ref[0].astype(jnp.bfloat16),
                        preferred_element_type=jnp.float32)
                + b_ref[...]).astype(o_ref.dtype)


def project_pallas(xd_cm, wproj, bproj, *, max_tile=2048):
    b, c, n = xd_cm.shape
    icp3 = wproj.shape[0]
    tn = _pick_tile(n, max_tile)
    return pl.pallas_call(
        _proj_kernel,
        out_shape=jax.ShapeDtypeStruct((b, icp3, n), jnp.bfloat16),
        grid=(b, n // tn),
        in_specs=[
            pl.BlockSpec((1, c, tn), lambda bi, ni: (bi, 0, ni)),
            pl.BlockSpec((icp3, c), lambda bi, ni: (0, 0)),
            pl.BlockSpec((icp3, 1), lambda bi, ni: (0, 0)),
        ],
        out_specs=pl.BlockSpec((1, icp3, tn), lambda bi, ni: (bi, 0, ni)),
        compiler_params=pltpu.CompilerParams(
            dimension_semantics=("parallel", "parallel"),
            vmem_limit_bytes=_VMEM_LIMIT),
    )(xd_cm, wproj, bproj)


# ----------------------------------------------------------------------------
# Kernel 1: flash-style non-local attention on the pre-projected tensors.
# grid = (batch, q_tiles, kv_tiles) with kv last ("arbitrary").
# Scores are computed transposed ((kv, q)) so max/sum are sublane reductions.
# ----------------------------------------------------------------------------
def _attn_kernel(th_ref, phi_ref, g_ref, y_ref, m_ref, l_ref, acc_ref, *,
                 exp_dtype):
    kv = pl.program_id(2)

    @pl.when(kv == 0)
    def _():
        m_ref[...] = jnp.full_like(m_ref, -jnp.inf)
        l_ref[...] = jnp.zeros_like(l_ref)
        acc_ref[...] = jnp.zeros_like(acc_ref)

    th = th_ref[0]                                                   # (ICp, tq) bf16
    phi = phi_ref[0]                                                 # (ICp, tkv) bf16
    g = g_ref[0]                                                     # (ICp, tkv) bf16

    # transposed scores: s[kv, q] = phi[:, kv] . theta[:, q]   (bf16 MXU, f32 acc)
    s = lax.dot_general(phi, th, (((0,), (0,)), ((), ())),
                        preferred_element_type=jnp.float32)          # (tkv, tq)

    m_prev = m_ref[...]                                              # (1, tq)
    m_new = jnp.maximum(m_prev, jnp.max(s, axis=0, keepdims=True))
    alpha = jnp.exp(m_prev - m_new)                                  # f32, tiny
    p = jnp.exp((s - m_new).astype(exp_dtype))                       # bf16 EUP on v6e/v7x
    l_ref[...] = alpha * l_ref[...] + jnp.sum(p.astype(jnp.float32),
                                              axis=0, keepdims=True)
    acc_ref[...] = alpha * acc_ref[...] + jnp.dot(
        g, p.astype(jnp.bfloat16), preferred_element_type=jnp.float32)
    m_ref[...] = m_new

    @pl.when(kv == pl.num_programs(2) - 1)
    def _():
        l = l_ref[...]
        r = pl.reciprocal(l, approx=True)
        r = r * (2.0 - l * r)                   # one Newton step, ~exact
        y_ref[0] = (acc_ref[...] * r).astype(y_ref.dtype)


def attention_pallas(proj, icp, *, tq_max=1024, tkv_max=512):
    b, _, n = proj.shape
    tq, tkv = _attention_tiles(b, n, tq_max=tq_max, tkv_max=tkv_max)
    grid = (b, n // tq, n // tkv)
    return pl.pallas_call(
        functools.partial(_attn_kernel, exp_dtype=_EXP_DTYPE),
        out_shape=jax.ShapeDtypeStruct((b, icp, n), jnp.bfloat16),
        grid=grid,
        in_specs=[
            pl.BlockSpec((1, icp, tq), lambda bi, qi, ki: (bi, 0, qi)),   # theta
            pl.BlockSpec((1, icp, tkv), lambda bi, qi, ki: (bi, 1, ki)),  # phi
            pl.BlockSpec((1, icp, tkv), lambda bi, qi, ki: (bi, 2, ki)),  # g
        ],
        out_specs=pl.BlockSpec((1, icp, tq), lambda bi, qi, ki: (bi, 0, qi)),
        scratch_shapes=[pltpu.VMEM((1, tq), jnp.float32),    # running max
                        pltpu.VMEM((1, tq), jnp.float32),    # running sum
                        pltpu.VMEM((icp, tq), jnp.float32)],  # output accumulator
        compiler_params=pltpu.CompilerParams(
            dimension_semantics=("parallel", "parallel", "arbitrary"),
            vmem_limit_bytes=_VMEM_LIMIT),
    )(proj, proj, proj)


# ----------------------------------------------------------------------------
# Kernel 2: BN statistics pass.  Computes z = x + out_conv(y_up) on the fly
# (z never written to HBM) and emits one lane-dense (2, C) partial-sum block
# per (batch, hw-tile): row 0 = sum(z), row 1 = sum(z^2).  The lane reduction
# is a ones-vector matmul so the result lands directly in row layout.
# ----------------------------------------------------------------------------
def _stats_kernel(x_ref, yup_ref, wout_ref, bout_ref, stats_ref):
    z = x_ref[0] + jnp.dot(wout_ref[...], yup_ref[0],
                           preferred_element_type=jnp.float32) + bout_ref[...]
    ones = jnp.ones((1, z.shape[1]), jnp.float32)
    zsum = lax.dot_general(ones, z, (((1,), (1,)), ((), ())),
                           preferred_element_type=jnp.float32)        # (1, C)
    zsq = lax.dot_general(ones, z * z, (((1,), (1,)), ((), ())),
                          preferred_element_type=jnp.float32)         # (1, C)
    stats_ref[0, 0] = jnp.concatenate([zsum, zsq], axis=0)            # (2, C)


def stats_pallas(x_cm, yup_cm, wout, bout, *, max_tile=4096):
    b, c, hw = x_cm.shape
    icp = wout.shape[1]
    thw = _pick_tile(hw, max_tile)
    nhw = hw // thw
    return pl.pallas_call(
        _stats_kernel,
        out_shape=jax.ShapeDtypeStruct((b, nhw, 2, c), jnp.float32),
        grid=(b, nhw),
        in_specs=[
            pl.BlockSpec((1, c, thw), lambda bi, hi: (bi, 0, hi)),
            pl.BlockSpec((1, icp, thw), lambda bi, hi: (bi, 0, hi)),
            pl.BlockSpec((c, icp), lambda bi, hi: (0, 0)),
            pl.BlockSpec((c, 1), lambda bi, hi: (0, 0)),
        ],
        out_specs=pl.BlockSpec((1, 1, 2, c), lambda bi, hi: (bi, hi, 0, 0)),
        compiler_params=pltpu.CompilerParams(
            dimension_semantics=("parallel", "parallel"),
            vmem_limit_bytes=_VMEM_LIMIT),
    )(x_cm, yup_cm, wout, bout)


# ----------------------------------------------------------------------------
# Kernel 3: BN apply pass.  Recomputes z (cheap MXU) and applies the folded
# BatchNorm affine in one FMA: out = z * scale + shift.
# ----------------------------------------------------------------------------
def _bn_apply_kernel(x_ref, yup_ref, wout_ref, bout_ref, scale_ref, shift_ref,
                     o_ref):
    z = x_ref[0] + jnp.dot(wout_ref[...], yup_ref[0],
                           preferred_element_type=jnp.float32) + bout_ref[...]
    o_ref[0] = z * scale_ref[...] + shift_ref[...]


def bn_apply_pallas(x_cm, yup_cm, wout, bout, scale, shift, *, max_tile=4096):
    b, c, hw = x_cm.shape
    icp = wout.shape[1]
    thw = _pick_tile(hw, max_tile)
    nhw = hw // thw
    return pl.pallas_call(
        _bn_apply_kernel,
        out_shape=jax.ShapeDtypeStruct((b, c, hw), jnp.float32),
        grid=(b, nhw),
        in_specs=[
            pl.BlockSpec((1, c, thw), lambda bi, hi: (bi, 0, hi)),
            pl.BlockSpec((1, icp, thw), lambda bi, hi: (bi, 0, hi)),
            pl.BlockSpec((c, icp), lambda bi, hi: (0, 0)),
            pl.BlockSpec((c, 1), lambda bi, hi: (0, 0)),
            pl.BlockSpec((c, 1), lambda bi, hi: (0, 0)),
            pl.BlockSpec((c, 1), lambda bi, hi: (0, 0)),
        ],
        out_specs=pl.BlockSpec((1, c, thw), lambda bi, hi: (bi, 0, hi)),
        compiler_params=pltpu.CompilerParams(
            dimension_semantics=("parallel", "parallel"),
            vmem_limit_bytes=_VMEM_LIMIT),
    )(x_cm, yup_cm, wout, bout, scale, shift)


# ----------------------------------------------------------------------------
# Full NonLocalBlock forward (downsample_factor = 0.5, BN in training mode,
# i.e. normalized with the current batch statistics).
# Params (channel-major 1x1 conv weights, mirroring the PyTorch module):
#   wg/wtheta/wphi (IC, C), bg/btheta/bphi (IC,)
#   wout (C, IC), bout (C,)
#   gamma (C,), beta (C,)     -> BatchNorm affine
# ----------------------------------------------------------------------------
def non_local_block(x, params, downsample_factor=0.5):
    b, c, h, w = x.shape
    ic = params["wg"].shape[0]
    icp = _round_up(ic, 8)           # sublane-aligned inter_channels (zero-padded)

    def pad_rows(m):
        return jnp.pad(m, ((0, icp - ic), (0, 0)))

    def pad_vec(v):
        return jnp.pad(v, (0, icp - ic))

    # stacked & padded projection weight: rows [theta; phi; g]
    wproj = jnp.concatenate([pad_rows(params["wtheta"]),
                             pad_rows(params["wphi"]),
                             pad_rows(params["wg"])], axis=0).astype(jnp.bfloat16)
    bproj = jnp.concatenate([pad_vec(params["btheta"]),
                             pad_vec(params["bphi"]),
                             pad_vec(params["bg"])])[:, None]            # (3*ICp, 1)
    wout_p = jnp.pad(params["wout"],
                     ((0, 0), (0, icp - ic))).astype(jnp.bfloat16)       # (C, ICp)
    bout = params["bout"][:, None]                                       # (C, 1)

    if downsample_factor < 1.0:
        dh, dw = int(h * downsample_factor), int(w * downsample_factor)
        x_down = jnp.einsum("oi,bcij,pj->bcop",
                            interp_matrix(dh, h), x, interp_matrix(dw, w))
    else:
        dh, dw = h, w
        x_down = x

    n = dh * dw
    xd_cm = x_down.reshape(b, c, n)                     # free reshape, channel-major

    proj = project_pallas(xd_cm, wproj, bproj)          # (b, 3*ICp, n) bf16
    y_cm = attention_pallas(proj, icp)                  # (b, ICp, n) bf16

    y_img = y_cm.reshape(b, icp, dh, dw)
    if downsample_factor < 1.0:
        y_up = jnp.einsum("oi,bcij,pj->bcop",
                          interp_matrix(h, dh), y_img, interp_matrix(w, dw))
    else:
        y_up = y_img

    hw = h * w
    x_cm = x.reshape(b, c, hw)                          # free reshape
    yup_cm = y_up.reshape(b, icp, hw).astype(jnp.bfloat16)   # halve HBM traffic

    # pass 1: per-(batch, hw-tile) partial sums; reduce outside (tiny).
    stats = stats_pallas(x_cm, yup_cm, wout_p, bout)    # (b, nhw, 2, c)
    count = float(b * hw)
    sum_z = stats[:, :, 0, :].sum(axis=(0, 1))          # (C,)
    sumsq_z = stats[:, :, 1, :].sum(axis=(0, 1))        # (C,)
    mean = sum_z / count
    # TODO(synk): E[z^2]-mean^2 can still lose precision when |mean| >> std;
    # switch to a centered/Welford stats pass if that regime matters.
    var = jnp.maximum(sumsq_z / count - mean * mean, 0.0)   # biased var, clamped

    scale = params["gamma"] * lax.rsqrt(var + EPS)      # folded BN affine
    shift = params["beta"] - mean * scale

    # pass 2: recompute z (cheap) and apply folded BN — z never hits HBM.
    out_cm = bn_apply_pallas(x_cm, yup_cm, wout_p, bout,
                             scale[:, None], shift[:, None])
    return out_cm.reshape(b, c, h, w)                   # free reshape


# ----------------------------------------------------------------------------
# Pure-JAX reference (same math, no Pallas, full f32) for a sanity check.
# ----------------------------------------------------------------------------
def reference(x, params, downsample_factor=0.5):
    b, c, h, w = x.shape
    ic = params["wg"].shape[0]
    dh, dw = int(h * downsample_factor), int(w * downsample_factor)
    x_down = jnp.einsum("oi,bcij,pj->bcop",
                        interp_matrix(dh, h), x, interp_matrix(dw, w))
    xd = x_down.reshape(b, c, dh * dw)
    g = jnp.einsum("oc,bcn->bon", params["wg"], xd) + params["bg"][None, :, None]
    th = jnp.einsum("oc,bcn->bon", params["wtheta"], xd) + params["btheta"][None, :, None]
    ph = jnp.einsum("oc,bcn->bon", params["wphi"], xd) + params["bphi"][None, :, None]
    f = jnp.einsum("bcn,bcm->bnm", th, ph)                         # theta_n . phi_m
    p = jax.nn.softmax(f, axis=-1)
    y = jnp.einsum("bnm,bcm->bcn", p, g)                           # (b, IC, N)
    y_img = y.reshape(b, ic, dh, dw)
    y_up = jnp.einsum("oi,bcij,pj->bcop",
                      interp_matrix(h, dh), y_img, interp_matrix(w, dw))
    z = x + jnp.einsum("oc,bchw->bohw", params["wout"], y_up) \
          + params["bout"].reshape(1, -1, 1, 1)
    mean = z.mean(axis=(0, 2, 3))
    var = z.var(axis=(0, 2, 3))
    return (z - mean.reshape(1, -1, 1, 1)) * lax.rsqrt(var + EPS).reshape(1, -1, 1, 1) \
        * params["gamma"].reshape(1, -1, 1, 1) + params["beta"].reshape(1, -1, 1, 1)


if __name__ == "__main__":
    B, C, H, W = 2, 16, 16, 16
    IC = C // 4

    key = jax.random.PRNGKey(0)
    ks = jax.random.split(key, 9)
    params = {
        "wg":     0.1 * jax.random.normal(ks[0], (IC, C), jnp.float32),
        "bg":     0.01 * jax.random.normal(ks[1], (IC,), jnp.float32),
        "wtheta": 0.1 * jax.random.normal(ks[2], (IC, C), jnp.float32),
        "btheta": 0.01 * jax.random.normal(ks[3], (IC,), jnp.float32),
        "wphi":   0.1 * jax.random.normal(ks[4], (IC, C), jnp.float32),
        "bphi":   0.01 * jax.random.normal(ks[5], (IC,), jnp.float32),
        "wout":   0.1 * jax.random.normal(ks[6], (C, IC), jnp.float32),
        "bout":   0.01 * jax.random.normal(ks[7], (C,), jnp.float32),
        "gamma":  jnp.ones((C,), jnp.float32),
        "beta":   jnp.zeros((C,), jnp.float32),
    }

    x = jax.random.normal(ks[8], (B, C, H, W), jnp.float32)

    out = jax.block_until_ready(non_local_block(x, params))
    ref = jax.block_until_ready(reference(x, params))

    assert out.shape == (B, C, H, W)
    max_err = float(jnp.max(jnp.abs(out - ref)))
    # tolerance reflects bf16 MXU operands / bf16 y / bf16 exp (v6e+); accumulation is f32.
    assert jnp.allclose(out, ref, rtol=5e-3, atol=5e-3), \
        f"mismatch vs reference (max abs err {max_err})"

    print("KERNEL_OK")
</pallas_src>

<mosaic_0001>
module attributes {stable_mosaic.version = 11 : i64} {
  func.func @_proj_kernel(%arg0: i32, %arg1: i32, %arg2: memref<1x16x64xf32, #tpu.memory_space<vmem>>, %arg3: memref<24x16xbf16, #tpu.memory_space<vmem>>, %arg4: memref<24x1xf32, #tpu.memory_space<vmem>>, %arg5: memref<1x24x64xbf16, #tpu.memory_space<vmem>>) attributes {dimension_semantics = [#tpu.dimension_semantics<parallel>, #tpu.dimension_semantics<parallel>], iteration_bounds = array<i64: 2, 1>, scalar_prefetch = 0 : i64, scratch_operands = 0 : i64, tpu.core_type = #tpu.core_type<tc>, window_params = [{transform_indices = @transform_0, window_bounds = array<i64: 1, 16, 64>}, {pipeline_mode = #tpu.pipeline_mode<synchronous>, transform_indices = @transform_1, window_bounds = array<i64: 24, 16>}, {pipeline_mode = #tpu.pipeline_mode<synchronous>, transform_indices = @transform_2, window_bounds = array<i64: 24, 1>}, {transform_indices = @transform_3, window_bounds = array<i64: 1, 24, 64>}]} {
    %c0 = arith.constant 0 : index
    %c0_0 = arith.constant 0 : index
    %0 = vector.load %arg3[%c0, %c0_0] : memref<24x16xbf16, #tpu.memory_space<vmem>>, vector<24x16xbf16>
    %c0_1 = arith.constant 0 : index
    %c0_2 = arith.constant 0 : index
    %c0_3 = arith.constant 0 : index
    %1 = vector.load %arg2[%c0_1, %c0_2, %c0_3] : memref<1x16x64xf32, #tpu.memory_space<vmem>>, vector<1x16x64xf32>
    %2 = vector.shape_cast %1 : vector<1x16x64xf32> to vector<16x64xf32>
    %3 = arith.truncf %2 : vector<16x64xf32> to vector<16x64xbf16>
    %cst = arith.constant dense<0.000000e+00> : vector<24x64xf32>
    %4 = tpu.matmul %0, %3, %cst {dimension_numbers = #tpu.dot_dimension_numbers<[1], [0], [0], [1], [0, 0, 1, 1], [], []>} : vector<24x16xbf16>, vector<16x64xbf16>, vector<24x64xf32> -> vector<24x64xf32>
    %c0_4 = arith.constant 0 : index
    %c0_5 = arith.constant 0 : index
    %5 = vector.load %arg4[%c0_4, %c0_5] : memref<24x1xf32, #tpu.memory_space<vmem>>, vector<24x1xf32>
    %6 = vector.broadcast %5 : vector<24x1xf32> to vector<24x64xf32>
    %7 = arith.addf %4, %6 : vector<24x64xf32>
    %8 = arith.truncf %7 : vector<24x64xf32> to vector<24x64xbf16>
    %c0_6 = arith.constant 0 : index
    %c0_7 = arith.constant 0 : index
    %c0_8 = arith.constant 0 : index
    %9 = vector.load %arg5[%c0_6, %c0_7, %c0_8] : memref<1x24x64xbf16, #tpu.memory_space<vmem>>, vector<1x24x64xbf16>
    %10 = vector.shape_cast %9 : vector<1x24x64xbf16> to vector<24x64xbf16>
    %11 = vector.shape_cast %8 : vector<24x64xbf16> to vector<1x24x64xbf16>
    tpu.vector_store %arg5[%c0_6, %c0_7, %c0_8], %11 {strides = array<i32>} : memref<1x24x64xbf16, #tpu.memory_space<vmem>>, vector<1x24x64xbf16>,
    return
  }
  func.func @transform_0(%arg0: i32, %arg1: i32) -> (i32, i32, i32) {
    %c0_i32 = arith.constant 0 : i32
    %c0_i32_0 = arith.constant 0 : i32
    return %arg0, %c0_i32, %arg1 : i32, i32, i32
  }
  func.func @transform_1(%arg0: i32, %arg1: i32) -> (i32, i32) {
    %c0_i32 = arith.constant 0 : i32
    %c0_i32_0 = arith.constant 0 : i32
    %c0_i32_1 = arith.constant 0 : i32
    return %c0_i32, %c0_i32_0 : i32, i32
  }
  func.func @transform_2(%arg0: i32, %arg1: i32) -> (i32, i32) {
    %c0_i32 = arith.constant 0 : i32
    %c0_i32_0 = arith.constant 0 : i32
    %c0_i32_1 = arith.constant 0 : i32
    return %c0_i32, %c0_i32_0 : i32, i32
  }
  func.func @transform_3(%arg0: i32, %arg1: i32) -> (i32, i32, i32) {
    %c0_i32 = arith.constant 0 : i32
    %c0_i32_0 = arith.constant 0 : i32
    return %arg0, %c0_i32, %arg1 : i32, i32, i32
  }
}

</mosaic_0001>

<bundles_post_ra>
// kernel: tpu_custom_call.1
= control target key start
LH: loop header
LB: loop body
LE: loop exit
PB: predicated region body
PF: predicated region fallthrough
CT: control target
= control target key end

     0   :  { %8 = vsyncpa [#allocation3], 0  ;;  %s1058_s0 = inlined_call_operand.hbm [shape: f32[2,16,64], index: 0, kind: input, shape index: {}]   ;;  %s1059_s1 = inlined_call_operand.hbm [shape: bf16[24,16], index: 1, kind: input, shape index: {}]   ;;  %s1060_s2 = inlined_call_operand.hbm [shape: f32[24,1], index: 2, kind: input, shape index: {}]   ;;  %s1061_s3 = inlined_call_operand.hbm [shape: bf16[2,24,64], index: 3, kind: output, shape index: {}]  }
   0x1   :  { %10 = vsyncpa [#allocation3 + $0x1], 0 }
   0x2   :  { %11 = vsyncpa [#allocation6], 0 }
   0x3   :  { %12 = vsyncpa [#allocation4], 0 }
   0x4   :  { %14 = vsyncpa [#allocation4 + $0x1], 0  ;;  %s796_s12 = smov 0   ;;  %s798_s13 = smov 0  }
   0x5   :  { %s800_s14 = smov 0   ;;  %s802_s15 = smov 0  }
   0x6   :  { %s804_s16 = smov 0   ;;  %s806_s17 = smov 0  }
   0x7 LB: > { %s459_s18 = sadd.s32 4294967295, %s763_s17   ;;  %s460_s19 = sadd.s32 4294967294, %s763_s17   ;;  %s763_s17 = sphi %s806_s17, %s20_s17   ;;  %s759_s16 = sphi %s804_s16, %s1083_s16   ;;  %s755_s15 = sphi %s802_s15, %s1082_s15   ;;  %s751_s14 = sphi %s800_s14, %s1081_s14   ;;  %s747_s13 = sphi %s798_s13, %s1080_s13   ;;  %s743_s12 = sphi %s796_s12, %s1079_s12  }
   0x8   : > { %p54_p0 = scmp.ne.s32.totalorder %s747_s13, %s743_s12  ;;  %p830_p1 = scmp.eq.s32.totalorder %s459_s18, 0 }
   0x9   : > { %p834_p2 = scmp.eq.s32.totalorder %s459_s18, 1  ;;  %p128_p3 = scmp.eq.s32.totalorder %s460_s19, 1 }
   0xa   : > { %s1066_s20 = scalar_select %p830_p1, 1, 0 }
   0xb   : > { %p840_p4 = por %p830_p1, %p54_p0  ;;  %p461_p5 = scmp.ge.s32.totalorder %s763_s17, 1 }
   0xc   : > { %p845_p6 = por %p128_p3, %p54_p0  ;;  %p135_p7 = scmp.lt.s32.totalorder %s763_s17, 3 }
   0xd   : > { %s1068_s22 = scalar_select %p840_p4, 1, 0 }
   0xe   : > { %s1069_s23 = scalar_select %p845_p6, 1, 0 }
   0xf   : > { %p850_p8 = pnand %p461_p5, %p135_p7  ;;  %s765_s25 = smov [#allocation5]  }
  0x10   : > { %s147_s26 = sshll.u32 %s765_s25, 4  ;;  %s766_s28 = smov [#allocation7]   ;;  %s854_s26 = int_to_ptr.vmem [resolvable:$true] %s147_s26 }
  0x11   : > { %p509_p9 = pneg %p850_p8  ;;  %s160_s29 = sshll.u32 %s766_s28, 4  ;;  %s865_s29 = int_to_ptr.vmem [resolvable:$true] %s160_s29 }
  0x12   : > { %s591_s5 = scalar_lea.hbm %s1059_s1, 192 }
  0x13   : > { %p861_p11 = pnand %p509_p9, %p830_p1  ;;  %p592_p12 = scmp.ne.s32.totalorder %s1059_s1, %s591_s5 }
  0x14   : > { %p598_p5 = scmp.lt.u32.totalorder %s591_s5, %s1059_s1 }
  0x15   : > { %p593_p13 = pneg %p861_p11 }
  0x17   : > { %p594_p0 = pnand %p593_p13, %p592_p12 }
  0x19   : > { %p595_p3 = pneg %p594_p0 }
  0x1b   : > { %p600_p7 = pnand %p598_p5, %p595_p3 }
  0x1d   : > { %603 = shalt.err (!%p600_p7)
}
  0x1e   : > { %s604_s10 = scalar_lea.vmem %s854_s26, 192  ;;  %p612_p1 = scmp.lt.s32.totalorder %s854_s26, %s854_s26 }
  0x1f   : > { %p605_p9 = scmp.ne.s32.totalorder %s854_s26, %s604_s10  ;;  %p613_p12 = scmp.lt.s32.totalorder %s604_s10, %s604_s10 }
  0x21   : > { %p607_p10 = pnand %p605_p9, %p593_p13  ;;  %p614_p0 = por %p613_p12, %p612_p1 }
  0x23   : > { %p608_p6 = pneg %p607_p10 }
  0x25   : > { %p615_p4 = pnand %p614_p0, %p608_p6 }
  0x27   : > { %618 = shalt.err (!%p615_p4)
}
  0x28   : > { %s767_s11 = smov 64   ;;  %s768_s18 = smov 4  }
  0x29   : > { %512 = dma.hbm_to_vmem [thread:$0]  (!%p861_p11), %s1059_s1, 192, %s854_s26, [#allocation6], %s767_s11, %s767_s11, %s768_s18  }
  0x2a   : > { %s619_s4 = scalar_lea.hbm %s1060_s2, 384 }
  0x2b   : > { %p620_p1 = scmp.ne.s32.totalorder %s1060_s2, %s619_s4  ;;  %p626_p10 = scmp.lt.u32.totalorder %s619_s4, %s1060_s2 }
  0x2d   : > { %p622_p4 = pnand %p620_p1, %p593_p13 }
  0x2f   : > { %p623_p6 = pneg %p622_p4 }
  0x31   : > { %p628_p3 = pnand %p626_p10, %p623_p6 }
  0x33   : > { %631 = shalt.err (!%p628_p3)
}
  0x34   : > { %s632_s26 = scalar_lea.vmem %s865_s29, 384  ;;  %p640_p12 = scmp.lt.s32.totalorder %s865_s29, %s865_s29 }
  0x35   : > { %p633_p5 = scmp.ne.s32.totalorder %s865_s29, %s632_s26  ;;  %p641_p0 = scmp.lt.s32.totalorder %s632_s26, %s632_s26 }
  0x37   : > { %p635_p7 = pnand %p633_p5, %p593_p13  ;;  %p642_p1 = por %p641_p0, %p640_p12 }
  0x39   : > { %p636_p9 = pneg %p635_p7 }
  0x3b   : > { %p643_p4 = pnand %p642_p1, %p636_p9 }
  0x3d   : > { %646 = shalt.err (!%p643_p4)
}
  0x3e   : > { %s769_s9 = smov 128   ;;  %s770_s10 = smov 8  }
  0x3f   : > { %515 = dma.hbm_to_vmem [thread:$0]  (!%p861_p11), %s1060_s2, 384, %s865_s29, [#allocation6], %s769_s9, %s769_s9, %s770_s10  }
  0x40   : > { %s32_s19 = sadd.s32 1, %s759_s16  ;;  %s41_s25 = sadd.s32 1, %s751_s14 }
  0x41   : > { %p34_p13 = scmp.ge.s32.totalorder %s32_s19, 2  ;;  %p48_p6 = scmp.ne.s32.totalorder %s751_s14, %s747_s13 }
  0x42   : > { %p49_p10 = scmp.eq.s32.totalorder %s763_s17, 0  ;;  %p526_p3 = scmp.lt.s32.totalorder %s763_s17, 2 }
  0x43   : > { %s1085_s19 = smov (%p34_p13, %s32_s19), 0  ;;  %p932_p7 = por %p834_p2, %p48_p6 }
  0x44   : > { %p50_p5 = por %p49_p10, %p48_p6  ;;  %s36_s28 = ssub.s32 %s759_s16, %s1085_s19 }
  0x45   : > { %s1072_s27 = scalar_select %p932_p7, 1, 0 }
  0x46   : > { %s174_s30 = sand.u32 1, %s751_s14   ;;  %p39_p9 = scmp.eq.s32.totalorder %s36_s28, 0 }
  0x47   : > { %s465_s29 = sshll.u32 %s174_s30, 4  ;;  %s482_s4 = sshll.u32 %s759_s16, 8 }
  0x48   : > { %s941_s5 = scalar_select %p39_p9, %s751_s14, %s41_s25  }
  0x49   : > { %s946_s8 = scalar_lea.hbm %s1058_s0, %s482_s4  ;;  %s178_s21 = scalar_lea.vmem [#allocation2], %s465_s29 }
  0x4a   : > { %s186_s26 = sshll.u32 %s178_s21, 4  ;;  %p950_p2 = pnand %p526_p3, %p50_p5  ;;  %s954_s26 = int_to_ptr.vmem [resolvable:$true] %s186_s26 }
  0x4b   : > { %s956_s18 = scalar_lea.sflag [#allocation3], %s174_s30  ;;  %s647_s25 = scalar_lea.hbm %s946_s8, 256 }
  0x4c   : > { %p648_p11 = scmp.ne.s32.totalorder %s946_s8, %s647_s25  ;;  %p649_p12 = pneg %p950_p2 }
  0x4d   : > { %s652_s4 = scalar_lea.hbm %s1058_s0, 512  ;;  %p653_p4 = scmp.lt.u32.totalorder %s946_s8, %s1058_s0 }
  0x4e   : > { %p650_p0 = pnand %p649_p12, %p648_p11  ;;  %p654_p13 = scmp.lt.u32.totalorder %s652_s4, %s647_s25 }
  0x4f   : > { %p656_p10 = scmp.lt.u32.totalorder %s647_s25, %s946_s8 }
  0x50   : > { %p651_p1 = pneg %p650_p0  ;;  %p655_p6 = por %p654_p13, %p653_p4 }
  0x52   : > { %p657_p3 = por %p656_p10, %p655_p6 }
  0x54   : > { %p658_p5 = pnand %p657_p3, %p651_p1 }
  0x56   : > { %661 = shalt.err (!%p658_p5)
}
  0x57   : > { %s662_s30 = scalar_lea.vmem %s954_s26, 256  ;;  %s771_s21 = smov [#allocation2]  }
  0x58   : > { %p663_p9 = scmp.ne.s32.totalorder %s954_s26, %s662_s30  ;;  %s667_s28 = sshll.u32 %s771_s21, 4  ;;  %s668_s28 = int_to_ptr.vmem [resolvable:$false] %s667_s28 }
  0x59   : > { %s669_s29 = scalar_lea.vmem %s668_s28, 512  ;;  %p670_p7 = scmp.lt.s32.totalorder %s954_s26, %s668_s28 }
  0x5a   : > { %p665_p11 = pnand %p663_p9, %p649_p12  ;;  %p671_p4 = scmp.lt.s32.totalorder %s669_s29, %s662_s30 }
  0x5c   : > { %p666_p0 = pneg %p665_p11  ;;  %p672_p13 = por %p671_p4, %p670_p7 }
  0x5e   : > { %p673_p6 = pnand %p672_p13, %p666_p0 }
  0x60   : > { %676 = shalt.err (!%p673_p6)
}
  0x61   : > { %519 = dma.hbm_to_vmem [thread:$0]  (!%p950_p2), %s946_s8, 256, %s954_s26, %s956_s18, %s769_s9, %s769_s9, %s770_s10  }
  0x62   : > { %198 = sbr.rel (%p850_p8) target bundleno = 350 (0x15e), region = 32  ;;  %s990_s25 = sand.u32 (!%p850_p8), 1, %s747_s13  }
  0x63   : > { %s469_s4 = sshll.u32 (!%p850_p8), %s990_s25, 4  ;;  %s201_s6 = scalar_lea.sflag (!%p850_p8), [#allocation3], %s990_s25 }
  0x64   : > { %s204_s7 = scalar_lea.vmem (!%p850_p8), [#allocation2], %s469_s4  ;;  %p1074_p7 = scmp.ne.s32.totalorder (!%p850_p8), %s1068_s22, 0 }
  0x69   : > { %730 = dma.done.wait (%p1074_p7), %s201_s6, 256  }
  0x6a   : > { %732 = vsyncadd (%p1074_p7), %s201_s6, 4294967040  ;;  %p1075_p12 = scmp.ne.s32.totalorder %s1066_s20, 0 }
  0x6c   : > { %734 = dma.done.wait (%p1075_p12), [#allocation6], 576  }
  0x6d   : > { %736 = vsyncadd (%p1075_p12), [#allocation6], 4294966720  ;;  %v772_v0 = vmov 0   ;;  %v239_v1 = vld [vmem:[%s204_s7] sm:$0xff]  ;;  %v240_v2 = vld [vmem:[%s204_s7 + $0x8] sm:$0xff]  ;;  %vm268_vm0 = vcmask 130048  }
  0x6e   : > { %587 = vset.pattern.permute.xlu0 %v772_v0  ;;  %588 = vset.pattern.permute.xlu1 %v772_v0  ;;  %v241_v3 = vpack.c.bf16 %v240_v2, %v239_v1  ;;  %v589_v4 = vld [vmem:[#allocation5] sm:$0xff]   ;;  %v242_v5 = vld [vmem:[#allocation7] sm:$0xff]  ;;  %v590_v6 = vld [vmem:[#allocation5 + $0x8] ss:$0 sps:$4 sm:$0xff]   ;;  %s495_s20 = smul.u32 12, %s990_s25  ;;  %vm336_vm1 = vcmask 519168  }
  0x6f   : > { %491 = vmatprep.mubr.msk.bf16.mxu0 %vm268_vm0, %v589_v4  ;;  %v244_v7 = vld [vmem:[#allocation7 + $0x10] sm:$0xff]  ;;  %247 = vperm.xlu0 %587, %v242_v5   ;;  %v243_v8 = vld [vmem:[#allocation7 + $0x8] sm:$0xff]  ;;  %s496_s9 = smul.u32 192, %s755_s15  ;;  %s341_s15 = scalar_lea.sflag [#allocation4], %s990_s25 }
  0x70   : > { %489 = vmatprep.subr.bf16.mxu0 %v241_v3  ;;  %257 = vperm.xlu1 %588, %v244_v7   ;;  %s234_s22 = scalar_lea.vmem [#allocation8], %s495_s20  ;;  %p1076_p2 = scmp.ne.s32.totalorder %s1072_s27, 0 }
  0x71   : > { %490 = vmatpush3.bf16.msra.mxu0 %v241_v3  ;;  %s355_s24 = sshll.u32 %s234_s22, 4  ;;  %s1009_s26 = scalar_lea.hbm %s1061_s3, %s496_s9  ;;  %s1004_s24 = int_to_ptr.vmem [resolvable:$true] %s355_s24 }
  0x72   : > { %s677_s11 = scalar_lea.vmem %s1004_s24, 192  ;;  %s773_s18 = smov [#allocation8]  }
  0x73   : > { %252 = vperm.xlu0 %587, %v243_v8   ;;  %p678_p8 = scmp.ne.s32.totalorder %s1004_s24, %s677_s11  ;;  %s681_s30 = sshll.u32 %s773_s18, 4  ;;  %s682_s30 = int_to_ptr.vmem [resolvable:$false] %s681_s30 }
  0x74   : > { %492 = vmatmul.mubr.msk.bf16.vlgmr.msra.gmra.mrb[0].mxu0 %vm268_vm0, %v590_v6  ;;  %s683_s21 = scalar_lea.vmem %s682_s30, 384  ;;  %p684_p3 = scmp.lt.s32.totalorder %s1004_s24, %s682_s30 }
  0x75   : > { %p679_p1 = pnand %p678_p8, %p1076_p2  ;;  %p685_p5 = scmp.lt.s32.totalorder %s683_s21, %s677_s11 }
  0x77   : > { %p680_p10 = pneg %p679_p1  ;;  %p686_p9 = por %p685_p5, %p684_p3 }
  0x79   : > { %p687_p11 = pnand %p686_p9, %p680_p10 }
  0xee   : > { %v248_v9 = vpop.permute.xlu0 %247 }
  0xef   : > { %v258_v10 = vpop.permute.xlu1 %257 }
  0xf2   : > { %v253_v16 = vpop.permute.xlu0 %252 }
 0x147   : > { %v493_v11 = vpop.f32.mrb[0].mxu0 }
 0x148   : > { %v318_v12 = vadd.f32 %v493_v11, %v258_v10  ;;  %v309_v13 = vpop.f32.mrb[1].mxu0 }
 0x149   : > { %v310_v14 = vadd.f32 %v309_v13, %v248_v9  ;;  %v494_v15 = vpop.f32.mrb[2].mxu0 }
 0x14a   : > { %v485_v17 = vpack.c.bf16 %v318_v12, %v318_v12  ;;  %v312_v18 = vpop.f32.mrb[3].mxu0 }
 0x14b   : > { %v483_v19 = vpack.c.bf16 %v310_v14, %v310_v14  ;;  %v313_v20 = vadd.f32 %v312_v18, %v253_v16 }
 0x14c   : > { %339 = vst.msk [vmem:[%s234_s22 + $0x8] sm:$0xf] %vm336_vm1, %v485_v17 }
 0x14d   : > { %337 = vst.msk [vmem:[%s234_s22] sm:$0xf] %vm336_vm1, %v483_v19  ;;  %v484_v21 = vpack.c.bf16 %v313_v20, %v313_v20 }
 0x14f   : > { %338 = vst.msk [vmem:[%s234_s22 + $0x4] sm:$0xf] %vm336_vm1, %v484_v21 }
 0x150   : > { %690 = shalt.err (!%p687_p11)
}
 0x151   : > { %s691_s28 = scalar_lea.hbm %s1009_s26, 192  ;;  %s695_s6 = scalar_lea.hbm %s1061_s3, 384 }
 0x152   : > { %p692_p0 = scmp.ne.s32.totalorder %s1009_s26, %s691_s28  ;;  %p696_p6 = scmp.lt.u32.totalorder %s1009_s26, %s1061_s3 }
 0x153   : > { %p697_p7 = scmp.lt.u32.totalorder %s695_s6, %s691_s28  ;;  %p699_p8 = scmp.lt.u32.totalorder %s691_s28, %s1009_s26 }
 0x154   : > { %p693_p4 = pnand %p692_p0, %p1076_p2 }
 0x155   : > { %p698_p12 = por %p697_p7, %p696_p6 }
 0x156   : > { %p694_p13 = pneg %p693_p4 }
 0x157   : > { %p700_p1 = por %p699_p8, %p698_p12 }
 0x159   : > { %p701_p10 = pnand %p700_p1, %p694_p13 }
 0x15b   : > { %704 = shalt.err (!%p701_p10)
}
 0x15c   : > { %s774_s22 = smov 64   ;;  %s775_s9 = smov 4  }
 0x15d   : > { %507 = dma.vmem_to_hbm [thread:$0]  (%p1076_p2), %s1004_s24, 192, %s1009_s26, %s341_s15, %s774_s22, %s774_s22, %s775_s9  }
 0x15e PF: > { %s370_s10 = sand.u32 1, %s743_s12   ;;  %p1077_p3 = scmp.ne.s32.totalorder %s1069_s23, 0 }
 0x15f   : > { %p1078_p5 = scmp.ge.s32.totalorder %s763_s17, 2  ;;  %s371_s8 = scalar_lea.sflag [#allocation4], %s370_s10 }
 0x161   : > { %p521_p9 = pnand %p1078_p5, %p1077_p3 }
 0x163   : > { %738 = dma.done.wait (!%p521_p9), %s371_s8, 192  }
 0x164   : > { %740 = vsyncadd (!%p521_p9), %s371_s8, 4294967104  ;;  %s20_s17 = sadd.s32 1, %s763_s17   ;;  %s1079_s12 = smov %s747_s13 }
 0x165   : > { %p17_p11 = scmp.ge.s32.totalorder %s20_s17, 4   ;;  %s1080_s13 = smov %s751_s14 }
 0x166   : > { %s1081_s14 = smov %s941_s5  ;;  %s1082_s15 = smov %s759_s16 }
 0x167   : > { %s1083_s16 = smov %s1085_s19  ;;  %19 = sbr.rel (!%p17_p11) target bundleno = 7 (0x7), region = 85 }
 0x16e   :  { %376 = vsyncpa [#allocation3], 1 }
 0x16f   :  { %378 = vsyncpa [#allocation3 + $0x1], 1 }
 0x170   :  { %379 = vsyncpa [#allocation6], 1 }
 0x171   :  { %380 = vsyncpa [#allocation4], 1 }
 0x172   :  { %382 = vsyncpa [#allocation4 + $0x1], 1 }

</bundles_post_ra>
